<compile_context>
chip_gen: v6e
topology: v6e:2x2x1
jax: 0.10.0
libtpu: 0.0.40
codegen_flags: <defaults>
</compile_context>

<pallas_src>
import math

import jax
import jax.numpy as jnp
from jax import lax
from jax.experimental import pallas as pl
from jax.experimental.pallas import tpu as pltpu


# Eval-mode RReLU negative slope: (lower + upper) / 2 = (1/8 + 1/3) / 2.
RRELU_SLOPE = (1.0 / 8.0 + 1.0 / 3.0) / 2.0

# MXU input dtype for the (memory-bound) propagation phase.  bf16 halves the
# dominant A/X DMA traffic and matches the bf16 MXU datapath on v6e/v7x; the
# GRU state, accumulators and all elementwise math remain f32.
PROP_MXU_DTYPE = jnp.bfloat16

_LANE = 128


def _round_up(x, m):
    return ((x + m - 1) // m) * m


def _pick_tile(n, pref=512):
    """Largest 128-aligned tile dividing n, capped at `pref` (full dim if small)."""
    if n <= pref:
        return n
    t = (pref // _LANE) * _LANE
    while t >= _LANE:
        if n % t == 0:
            return t
        t -= _LANE
    # TODO(synk): pad N to a multiple of 128/512 for ragged graph sizes instead
    #             of falling back to a whole-array block.
    return n


# ------------------------- Phase 1: weight evolution -------------------------


def _evolve_weights_kernel(wzb_u_ref, wzb_r_ref, wzb_h_ref,
                           uu_ref, ur_ref, uhc_ref, w0_ref, h_all_ref):
    """Sequential GRU evolution of the GCN weight matrix (single invocation).

      wzb_*_ref : (T, in, out_p)  hoisted W_g @ z_topk[t] + b_g per gate
      uu/ur/uhc : (in, in)        U_update / U_reset / U_h_cap
      w0_ref    : (in, out_p)     initial GCN weights (read once)
      h_all_ref : (T, in, out_p)  output — evolved weights per step
    """
    nt = h_all_ref.shape[0]
    uu = uu_ref[...]
    ur = ur_ref[...]
    uhc = uhc_ref[...]

    dot = lambda a, b: jnp.dot(a, b, preferred_element_type=jnp.float32)

    def step(t, h):
        update = jax.nn.sigmoid(wzb_u_ref[t] + dot(uu, h))
        reset = jax.nn.sigmoid(wzb_r_ref[t] + dot(ur, h))
        h_cap = jnp.tanh(wzb_h_ref[t] + dot(uhc, reset * h))
        h_new = (1.0 - update) * h + update * h_cap
        h_all_ref[t] = h_new
        return h_new

    # Per-step work is a few tiny matmuls; a fully unrolled in-kernel loop
    # avoids T pipeline grid steps (~0.35 us each) and keeps H resident.
    lax.fori_loop(0, nt, step, w0_ref[...], unroll=True)


# ------------------------- Phase 2: GCN propagation --------------------------


def _gcn_prop_kernel(a_ref, x_ref, h_ref, o_ref, acc_ref):
    """One (t, row-tile, K-tile) step of  RReLU(A[t] @ (X[t] @ H[t])).

      a_ref : (tm, tk)      bf16 adjacency tile
      x_ref : (tk, in)      bf16 node-embedding rows for this K tile
      h_ref : (in, out_p)   f32 evolved GCN weights for step t
      o_ref : (tm, out_p)   output tile (written on the last K step, lane-dense)
      acc_ref: (tm, out_p)  f32 VMEM accumulator (persists across K steps)
    """
    kk = pl.program_id(2)

    @pl.when(kk == 0)
    def _():
        acc_ref[...] = jnp.zeros_like(acc_ref)

    # xw is recomputed per row-tile (redundancy factor ~ in/tm, negligible);
    # it avoids an HBM round trip for the XW intermediate.
    h = h_ref[...].astype(x_ref.dtype)                                 # bf16 MXU input
    xw = jnp.dot(x_ref[...], h, preferred_element_type=jnp.float32)    # (tk, out_p) f32
    acc_ref[...] += jnp.dot(a_ref[...], xw.astype(a_ref.dtype),
                            preferred_element_type=jnp.float32)

    @pl.when(kk == pl.num_programs(2) - 1)
    def _():
        y = acc_ref[...]
        o_ref[...] = jnp.where(y >= 0.0, y, y * RRELU_SLOPE).astype(o_ref.dtype)


# --------------------------------- JAX glue ----------------------------------


def _precompute_z_topk_all(node_embs_all, mask_all, scorer, k):
    """Batched score / top-k / gather for all T snapshots (plain JAX)."""
    scorer_n = scorer / jnp.linalg.norm(scorer)                             # normalize once
    scores = jnp.einsum("tnd,do->tno", node_embs_all, scorer_n) + mask_all  # (T,N,1)
    scores_flat = scores[..., 0]                                            # (T,N)

    vals, idx = lax.top_k(scores_flat, k)                                   # (T,k)
    valid = vals > -jnp.inf
    num_valid = jnp.sum(valid.astype(jnp.int32), axis=-1)                   # (T,)
    last_valid = jnp.maximum(num_valid - 1, 0)
    pad_idx = jax.vmap(lambda i, lv: i[lv])(idx, last_valid)                # (T,)
    idx = jnp.where(valid, idx, pad_idx[:, None])

    z = jax.vmap(lambda e, i: e[i])(node_embs_all, idx)                     # (T,k,in)
    s_sel = jax.vmap(lambda s, i: s[i])(scores_flat, idx)                   # (T,k)
    z = z * jnp.tanh(s_sel)[..., None]
    return jnp.swapaxes(z, 1, 2)                                            # (T,in,k)


@jax.jit
def _grcu_forward_stacked(params, A_list, node_embs_list, mask_list):
    T, N, in_f = node_embs_list.shape
    out_f = params["GCN_init_weights"].shape[1]
    out_p = _round_up(out_f, _LANE)           # lane-dense output / state columns
    pad = out_p - out_f

    # --- Hoisted data-dependent top-k selection (plain JAX). -----------------
    z_all = _precompute_z_topk_all(
        node_embs_list, mask_list, params["scorer"], out_f)                 # (T,in,out)

    # --- Hoisted z-dependent gate pre-activations (independent of H). --------
    wzb_u = jnp.einsum("ij,tjo->tio", params["W_update"], z_all) + params["b_update"]
    wzb_r = jnp.einsum("ij,tjo->tio", params["W_reset"], z_all) + params["b_reset"]
    wzb_h = jnp.einsum("ij,tjo->tio", params["W_h_cap"], z_all) + params["b_h_cap"]
    w0 = params["GCN_init_weights"]
    if pad:
        pad3 = ((0, 0), (0, 0), (0, pad))
        wzb_u = jnp.pad(wzb_u, pad3)
        wzb_r = jnp.pad(wzb_r, pad3)
        wzb_h = jnp.pad(wzb_h, pad3)
        w0 = jnp.pad(w0, ((0, 0), (0, pad)))   # padded H columns stay exactly 0

    # --- Phase 1: sequential weight evolution (one kernel, state in VMEM). ---
    # TODO(synk): chunk the hoisted (T, in, out_p) blocks over T if they exceed
    #             VMEM for very long sequences / large in_feats.
    h_all = pl.pallas_call(
        _evolve_weights_kernel,
        out_shape=jax.ShapeDtypeStruct((T, in_f, out_p), jnp.float32),
    )(wzb_u, wzb_r, wzb_h,
      params["U_update"], params["U_reset"], params["U_h_cap"], w0)

    # --- Phase 2: tiled, parallel GCN propagation. ----------------------------
    a_c = A_list.astype(PROP_MXU_DTYPE)
    x_c = node_embs_list.astype(PROP_MXU_DTYPE)

    tm = _pick_tile(N)
    tk = _pick_tile(N)
    grid = (T, N // tm, N // tk)

    out = pl.pallas_call(
        _gcn_prop_kernel,
        out_shape=jax.ShapeDtypeStruct((T, N, out_p), jnp.float32),
        grid_spec=pltpu.PrefetchScalarGridSpec(
            num_scalar_prefetch=0,
            grid=grid,
            in_specs=[
                pl.BlockSpec((None, tm, tk), lambda t, i, k: (t, i, k)),      # A tile
                pl.BlockSpec((None, tk, in_f), lambda t, i, k: (t, k, 0)),    # X rows
                pl.BlockSpec((None, in_f, out_p), lambda t, i, k: (t, 0, 0)), # H[t]
            ],
            out_specs=pl.BlockSpec((None, tm, out_p), lambda t, i, k: (t, i, 0)),
            scratch_shapes=[pltpu.VMEM((tm, out_p), jnp.float32)],
        ),
        compiler_params=pltpu.CompilerParams(
            # T and row tiles are independent (megacore / dual-TC); the K axis
            # carries the f32 accumulator.
            dimension_semantics=("parallel", "parallel", "arbitrary"),
        ),
    )(a_c, x_c, h_all)

    return out[:, :, :out_f]


def grcu_forward(params, A_list, node_embs_list, mask_list):
    out = _grcu_forward_stacked(params, A_list, node_embs_list, mask_list)
    return [out[t] for t in range(out.shape[0])]


# ----------------------- Pure-JAX reference (for checking) -------------------


def _grcu_reference(params, A_list, node_embs_list, mask_list):
    k = params["GCN_init_weights"].shape[1]
    z_all = _precompute_z_topk_all(node_embs_list, mask_list, params["scorer"], k)
    h = params["GCN_init_weights"]
    outs = []
    for t in range(A_list.shape[0]):
        z = z_all[t]
        update = jax.nn.sigmoid(params["W_update"] @ z + params["U_update"] @ h
                                + params["b_update"])
        reset = jax.nn.sigmoid(params["W_reset"] @ z + params["U_reset"] @ h
                               + params["b_reset"])
        h_cap = jnp.tanh(params["W_h_cap"] @ z + params["U_h_cap"] @ (reset * h)
                         + params["b_h_cap"])
        h = (1.0 - update) * h + update * h_cap
        y = A_list[t] @ (node_embs_list[t] @ h)
        outs.append(jnp.where(y >= 0.0, y, y * RRELU_SLOPE))
    return outs


# --------------------------------- Param init --------------------------------


def init_params(key, in_feats, out_feats):
    keys = jax.random.split(key, 8)
    u = lambda k, shape, stdv: jax.random.uniform(
        k, shape, jnp.float32, minval=-stdv, maxval=stdv)
    stdv_in = 1.0 / math.sqrt(in_feats)
    return {
        "W_update": u(keys[0], (in_feats, in_feats), stdv_in),
        "U_update": u(keys[1], (in_feats, in_feats), stdv_in),
        "b_update": jnp.zeros((in_feats, out_feats), jnp.float32),
        "W_reset": u(keys[2], (in_feats, in_feats), stdv_in),
        "U_reset": u(keys[3], (in_feats, in_feats), stdv_in),
        "b_reset": jnp.zeros((in_feats, out_feats), jnp.float32),
        "W_h_cap": u(keys[4], (in_feats, in_feats), stdv_in),
        "U_h_cap": u(keys[5], (in_feats, in_feats), stdv_in),
        "b_h_cap": jnp.zeros((in_feats, out_feats), jnp.float32),
        "scorer": u(keys[6], (in_feats, 1), 1.0 / math.sqrt(1)),
        "GCN_init_weights": u(keys[7], (in_feats, out_feats),
                              1.0 / math.sqrt(out_feats)),
    }


# ------------------------------------ main ------------------------------------


if __name__ == "__main__":
    N, IN_FEATS, OUT_FEATS, T = 16, 8, 4, 3

    root = jax.random.PRNGKey(0)
    k_par, k_a, k_x = jax.random.split(root, 3)

    params = init_params(k_par, IN_FEATS, OUT_FEATS)

    # Symmetric, self-looped, row-normalized adjacency stack (T, N, N).
    a_raw = jax.random.uniform(k_a, (T, N, N), jnp.float32)
    a_sym = (a_raw + jnp.swapaxes(a_raw, 1, 2)) * 0.5 + jnp.eye(N)[None]
    A_list = a_sym / jnp.sum(a_sym, axis=-1, keepdims=True)

    # Node embeddings (T, N, in_feats).
    node_embs_list = jax.random.normal(k_x, (T, N, IN_FEATS), jnp.float32)

    # Masks (T, N, 1): mark the last node of each snapshot as absent (-inf).
    mask_list = jnp.zeros((T, N, 1), jnp.float32)
    mask_list = mask_list.at[:, -1, 0].set(-jnp.inf)

    out_seq = grcu_forward(params, A_list, node_embs_list, mask_list)
    for o in out_seq:
        jax.block_until_ready(o)

    assert len(out_seq) == T
    assert all(o.shape == (N, OUT_FEATS) for o in out_seq)
    assert all(bool(jnp.all(jnp.isfinite(o))) for o in out_seq)

    # Loose check vs. a pure-f32 JAX reference (tolerance covers the intentional
    # bf16 MXU inputs in the propagation phase; expected delta ~1e-2).
    ref_seq = _grcu_reference(params, A_list, node_embs_list, mask_list)
    for o, r in zip(out_seq, ref_seq):
        assert bool(jnp.allclose(o, r, atol=3e-2, rtol=3e-2))

    print("KERNEL_OK")
</pallas_src>

<mosaic_0001>
module attributes {stable_mosaic.version = 11 : i64} {
  func.func @_evolve_weights_kernel(%arg0: memref<3x8x128xf32, #tpu.memory_space<vmem>>, %arg1: memref<3x8x128xf32, #tpu.memory_space<vmem>>, %arg2: memref<3x8x128xf32, #tpu.memory_space<vmem>>, %arg3: memref<8x8xf32, #tpu.memory_space<vmem>>, %arg4: memref<8x8xf32, #tpu.memory_space<vmem>>, %arg5: memref<8x8xf32, #tpu.memory_space<vmem>>, %arg6: memref<8x128xf32, #tpu.memory_space<vmem>>, %arg7: memref<3x8x128xf32, #tpu.memory_space<vmem>>) attributes {dimension_semantics = [], scalar_prefetch = 0 : i64, scratch_operands = 0 : i64, tpu.core_type = #tpu.core_type<tc>} {
    %c0 = arith.constant 0 : index
    %c0_0 = arith.constant 0 : index
    %0 = vector.load %arg3[%c0, %c0_0] : memref<8x8xf32, #tpu.memory_space<vmem>>, vector<8x8xf32>
    %c0_1 = arith.constant 0 : index
    %c0_2 = arith.constant 0 : index
    %1 = vector.load %arg4[%c0_1, %c0_2] : memref<8x8xf32, #tpu.memory_space<vmem>>, vector<8x8xf32>
    %c0_3 = arith.constant 0 : index
    %c0_4 = arith.constant 0 : index
    %2 = vector.load %arg5[%c0_3, %c0_4] : memref<8x8xf32, #tpu.memory_space<vmem>>, vector<8x8xf32>
    %c0_5 = arith.constant 0 : index
    %c0_6 = arith.constant 0 : index
    %3 = vector.load %arg6[%c0_5, %c0_6] : memref<8x128xf32, #tpu.memory_space<vmem>>, vector<8x128xf32>
    %c0_i32 = arith.constant 0 : i32
    %4 = arith.index_cast %c0_i32 : i32 to index
    %c0_7 = arith.constant 0 : index
    %c0_8 = arith.constant 0 : index
    %5 = vector.load %arg0[%4, %c0_7, %c0_8] : memref<3x8x128xf32, #tpu.memory_space<vmem>>, vector<1x8x128xf32>
    %6 = vector.shape_cast %5 : vector<1x8x128xf32> to vector<8x128xf32>
    %cst = arith.constant dense<0.000000e+00> : vector<8x128xf32>
    %7 = tpu.matmul %0, %3, %cst {dimension_numbers = #tpu.dot_dimension_numbers<[1], [0], [0], [1], [0, 0, 1, 1], [], []>} : vector<8x8xf32>, vector<8x128xf32>, vector<8x128xf32> -> vector<8x128xf32>
    %8 = arith.addf %6, %7 : vector<8x128xf32>
    %9 = arith.negf %8 : vector<8x128xf32>
    %10 = math.exp %9 : vector<8x128xf32>
    %cst_9 = arith.constant 1.000000e+00 : f32
    %11 = vector.broadcast %cst_9 : f32 to vector<8x128xf32>
    %12 = arith.addf %11, %10 : vector<8x128xf32>
    %13 = arith.divf %11, %12 : vector<8x128xf32>
    %14 = arith.index_cast %c0_i32 : i32 to index
    %c0_10 = arith.constant 0 : index
    %c0_11 = arith.constant 0 : index
    %15 = vector.load %arg1[%14, %c0_10, %c0_11] : memref<3x8x128xf32, #tpu.memory_space<vmem>>, vector<1x8x128xf32>
    %16 = vector.shape_cast %15 : vector<1x8x128xf32> to vector<8x128xf32>
    %cst_12 = arith.constant dense<0.000000e+00> : vector<8x128xf32>
    %17 = tpu.matmul %1, %3, %cst_12 {dimension_numbers = #tpu.dot_dimension_numbers<[1], [0], [0], [1], [0, 0, 1, 1], [], []>} : vector<8x8xf32>, vector<8x128xf32>, vector<8x128xf32> -> vector<8x128xf32>
    %18 = arith.addf %16, %17 : vector<8x128xf32>
    %19 = arith.negf %18 : vector<8x128xf32>
    %20 = math.exp %19 : vector<8x128xf32>
    %cst_13 = arith.constant 1.000000e+00 : f32
    %21 = vector.broadcast %cst_13 : f32 to vector<8x128xf32>
    %22 = arith.addf %21, %20 : vector<8x128xf32>
    %23 = arith.divf %21, %22 : vector<8x128xf32>
    %24 = arith.index_cast %c0_i32 : i32 to index
    %c0_14 = arith.constant 0 : index
    %c0_15 = arith.constant 0 : index
    %25 = vector.load %arg2[%24, %c0_14, %c0_15] : memref<3x8x128xf32, #tpu.memory_space<vmem>>, vector<1x8x128xf32>
    %26 = vector.shape_cast %25 : vector<1x8x128xf32> to vector<8x128xf32>
    %27 = arith.mulf %23, %3 : vector<8x128xf32>
    %cst_16 = arith.constant dense<0.000000e+00> : vector<8x128xf32>
    %28 = tpu.matmul %2, %27, %cst_16 {dimension_numbers = #tpu.dot_dimension_numbers<[1], [0], [0], [1], [0, 0, 1, 1], [], []>} : vector<8x8xf32>, vector<8x128xf32>, vector<8x128xf32> -> vector<8x128xf32>
    %29 = arith.addf %26, %28 : vector<8x128xf32>
    %30 = math.tanh %29 : vector<8x128xf32>
    %cst_17 = arith.constant 1.000000e+00 : f32
    %31 = vector.broadcast %cst_17 : f32 to vector<8x128xf32>
    %32 = arith.subf %31, %13 : vector<8x128xf32>
    %33 = arith.mulf %32, %3 : vector<8x128xf32>
    %34 = arith.mulf %13, %30 : vector<8x128xf32>
    %35 = arith.addf %33, %34 : vector<8x128xf32>
    %36 = arith.index_cast %c0_i32 : i32 to index
    %c0_18 = arith.constant 0 : index
    %c0_19 = arith.constant 0 : index
    %37 = vector.load %arg7[%36, %c0_18, %c0_19] : memref<3x8x128xf32, #tpu.memory_space<vmem>>, vector<1x8x128xf32>
    %38 = vector.shape_cast %37 : vector<1x8x128xf32> to vector<8x128xf32>
    %39 = vector.shape_cast %35 : vector<8x128xf32> to vector<1x8x128xf32>
    tpu.vector_store %arg7[%36, %c0_18, %c0_19], %39 {strides = array<i32>} : memref<3x8x128xf32, #tpu.memory_space<vmem>>, vector<1x8x128xf32>,
    %c1_i32 = arith.constant 1 : i32
    %40 = arith.index_cast %c1_i32 : i32 to index
    %c0_20 = arith.constant 0 : index
    %c0_21 = arith.constant 0 : index
    %41 = vector.load %arg0[%40, %c0_20, %c0_21] : memref<3x8x128xf32, #tpu.memory_space<vmem>>, vector<1x8x128xf32>
    %42 = vector.shape_cast %41 : vector<1x8x128xf32> to vector<8x128xf32>
    %cst_22 = arith.constant dense<0.000000e+00> : vector<8x128xf32>
    %43 = tpu.matmul %0, %35, %cst_22 {dimension_numbers = #tpu.dot_dimension_numbers<[1], [0], [0], [1], [0, 0, 1, 1], [], []>} : vector<8x8xf32>, vector<8x128xf32>, vector<8x128xf32> -> vector<8x128xf32>
    %44 = arith.addf %42, %43 : vector<8x128xf32>
    %45 = arith.negf %44 : vector<8x128xf32>
    %46 = math.exp %45 : vector<8x128xf32>
    %cst_23 = arith.constant 1.000000e+00 : f32
    %47 = vector.broadcast %cst_23 : f32 to vector<8x128xf32>
    %48 = arith.addf %47, %46 : vector<8x128xf32>
    %49 = arith.divf %47, %48 : vector<8x128xf32>
    %50 = arith.index_cast %c1_i32 : i32 to index
    %c0_24 = arith.constant 0 : index
    %c0_25 = arith.constant 0 : index
    %51 = vector.load %arg1[%50, %c0_24, %c0_25] : memref<3x8x128xf32, #tpu.memory_space<vmem>>, vector<1x8x128xf32>
    %52 = vector.shape_cast %51 : vector<1x8x128xf32> to vector<8x128xf32>
    %cst_26 = arith.constant dense<0.000000e+00> : vector<8x128xf32>
    %53 = tpu.matmul %1, %35, %cst_26 {dimension_numbers = #tpu.dot_dimension_numbers<[1], [0], [0], [1], [0, 0, 1, 1], [], []>} : vector<8x8xf32>, vector<8x128xf32>, vector<8x128xf32> -> vector<8x128xf32>
    %54 = arith.addf %52, %53 : vector<8x128xf32>
    %55 = arith.negf %54 : vector<8x128xf32>
    %56 = math.exp %55 : vector<8x128xf32>
    %cst_27 = arith.constant 1.000000e+00 : f32
    %57 = vector.broadcast %cst_27 : f32 to vector<8x128xf32>
    %58 = arith.addf %57, %56 : vector<8x128xf32>
    %59 = arith.divf %57, %58 : vector<8x128xf32>
    %60 = arith.index_cast %c1_i32 : i32 to index
    %c0_28 = arith.constant 0 : index
    %c0_29 = arith.constant 0 : index
    %61 = vector.load %arg2[%60, %c0_28, %c0_29] : memref<3x8x128xf32, #tpu.memory_space<vmem>>, vector<1x8x128xf32>
    %62 = vector.shape_cast %61 : vector<1x8x128xf32> to vector<8x128xf32>
    %63 = arith.mulf %59, %35 : vector<8x128xf32>
    %cst_30 = arith.constant dense<0.000000e+00> : vector<8x128xf32>
    %64 = tpu.matmul %2, %63, %cst_30 {dimension_numbers = #tpu.dot_dimension_numbers<[1], [0], [0], [1], [0, 0, 1, 1], [], []>} : vector<8x8xf32>, vector<8x128xf32>, vector<8x128xf32> -> vector<8x128xf32>
    %65 = arith.addf %62, %64 : vector<8x128xf32>
    %66 = math.tanh %65 : vector<8x128xf32>
    %cst_31 = arith.constant 1.000000e+00 : f32
    %67 = vector.broadcast %cst_31 : f32 to vector<8x128xf32>
    %68 = arith.subf %67, %49 : vector<8x128xf32>
    %69 = arith.mulf %68, %35 : vector<8x128xf32>
    %70 = arith.mulf %49, %66 : vector<8x128xf32>
    %71 = arith.addf %69, %70 : vector<8x128xf32>
    %72 = arith.index_cast %c1_i32 : i32 to index
    %c0_32 = arith.constant 0 : index
    %c0_33 = arith.constant 0 : index
    %73 = vector.load %arg7[%72, %c0_32, %c0_33] : memref<3x8x128xf32, #tpu.memory_space<vmem>>, vector<1x8x128xf32>
    %74 = vector.shape_cast %73 : vector<1x8x128xf32> to vector<8x128xf32>
    %75 = vector.shape_cast %71 : vector<8x128xf32> to vector<1x8x128xf32>
    tpu.vector_store %arg7[%72, %c0_32, %c0_33], %75 {strides = array<i32>} : memref<3x8x128xf32, #tpu.memory_space<vmem>>, vector<1x8x128xf32>,
    %c2_i32 = arith.constant 2 : i32
    %76 = arith.index_cast %c2_i32 : i32 to index
    %c0_34 = arith.constant 0 : index
    %c0_35 = arith.constant 0 : index
    %77 = vector.load %arg0[%76, %c0_34, %c0_35] : memref<3x8x128xf32, #tpu.memory_space<vmem>>, vector<1x8x128xf32>
    %78 = vector.shape_cast %77 : vector<1x8x128xf32> to vector<8x128xf32>
    %cst_36 = arith.constant dense<0.000000e+00> : vector<8x128xf32>
    %79 = tpu.matmul %0, %71, %cst_36 {dimension_numbers = #tpu.dot_dimension_numbers<[1], [0], [0], [1], [0, 0, 1, 1], [], []>} : vector<8x8xf32>, vector<8x128xf32>, vector<8x128xf32> -> vector<8x128xf32>
    %80 = arith.addf %78, %79 : vector<8x128xf32>
    %81 = arith.negf %80 : vector<8x128xf32>
    %82 = math.exp %81 : vector<8x128xf32>
    %cst_37 = arith.constant 1.000000e+00 : f32
    %83 = vector.broadcast %cst_37 : f32 to vector<8x128xf32>
    %84 = arith.addf %83, %82 : vector<8x128xf32>
    %85 = arith.divf %83, %84 : vector<8x128xf32>
    %86 = arith.index_cast %c2_i32 : i32 to index
    %c0_38 = arith.constant 0 : index
    %c0_39 = arith.constant 0 : index
    %87 = vector.load %arg1[%86, %c0_38, %c0_39] : memref<3x8x128xf32, #tpu.memory_space<vmem>>, vector<1x8x128xf32>
    %88 = vector.shape_cast %87 : vector<1x8x128xf32> to vector<8x128xf32>
    %cst_40 = arith.constant dense<0.000000e+00> : vector<8x128xf32>
    %89 = tpu.matmul %1, %71, %cst_40 {dimension_numbers = #tpu.dot_dimension_numbers<[1], [0], [0], [1], [0, 0, 1, 1], [], []>} : vector<8x8xf32>, vector<8x128xf32>, vector<8x128xf32> -> vector<8x128xf32>
    %90 = arith.addf %88, %89 : vector<8x128xf32>
    %91 = arith.negf %90 : vector<8x128xf32>
    %92 = math.exp %91 : vector<8x128xf32>
    %cst_41 = arith.constant 1.000000e+00 : f32
    %93 = vector.broadcast %cst_41 : f32 to vector<8x128xf32>
    %94 = arith.addf %93, %92 : vector<8x128xf32>
    %95 = arith.divf %93, %94 : vector<8x128xf32>
    %96 = arith.index_cast %c2_i32 : i32 to index
    %c0_42 = arith.constant 0 : index
    %c0_43 = arith.constant 0 : index
    %97 = vector.load %arg2[%96, %c0_42, %c0_43] : memref<3x8x128xf32, #tpu.memory_space<vmem>>, vector<1x8x128xf32>
    %98 = vector.shape_cast %97 : vector<1x8x128xf32> to vector<8x128xf32>
    %99 = arith.mulf %95, %71 : vector<8x128xf32>
    %cst_44 = arith.constant dense<0.000000e+00> : vector<8x128xf32>
    %100 = tpu.matmul %2, %99, %cst_44 {dimension_numbers = #tpu.dot_dimension_numbers<[1], [0], [0], [1], [0, 0, 1, 1], [], []>} : vector<8x8xf32>, vector<8x128xf32>, vector<8x128xf32> -> vector<8x128xf32>
    %101 = arith.addf %98, %100 : vector<8x128xf32>
    %102 = math.tanh %101 : vector<8x128xf32>
    %cst_45 = arith.constant 1.000000e+00 : f32
    %103 = vector.broadcast %cst_45 : f32 to vector<8x128xf32>
    %104 = arith.subf %103, %85 : vector<8x128xf32>
    %105 = arith.mulf %104, %71 : vector<8x128xf32>
    %106 = arith.mulf %85, %102 : vector<8x128xf32>
    %107 = arith.addf %105, %106 : vector<8x128xf32>
    %108 = arith.index_cast %c2_i32 : i32 to index
    %c0_46 = arith.constant 0 : index
    %c0_47 = arith.constant 0 : index
    %109 = vector.load %arg7[%108, %c0_46, %c0_47] : memref<3x8x128xf32, #tpu.memory_space<vmem>>, vector<1x8x128xf32>
    %110 = vector.shape_cast %109 : vector<1x8x128xf32> to vector<8x128xf32>
    %111 = vector.shape_cast %107 : vector<8x128xf32> to vector<1x8x128xf32>
    tpu.vector_store %arg7[%108, %c0_46, %c0_47], %111 {strides = array<i32>} : memref<3x8x128xf32, #tpu.memory_space<vmem>>, vector<1x8x128xf32>,
    %c3_i32 = arith.constant 3 : i32
    return
  }
}

module attributes {stable_mosaic.version = 11 : i64} {
  func.func @_gcn_prop_kernel(%arg0: i32, %arg1: i32, %arg2: i32, %arg3: memref<1x16x16xbf16, #tpu.memory_space<vmem>>, %arg4: memref<1x16x8xbf16, #tpu.memory_space<vmem>>, %arg5: memref<1x8x128xf32, #tpu.memory_space<vmem>>, %arg6: memref<1x16x128xf32, #tpu.memory_space<vmem>>, %arg7: memref<16x128xf32, #tpu.memory_space<vmem>>) attributes {dimension_semantics = [#tpu.dimension_semantics<parallel>, #tpu.dimension_semantics<parallel>, #tpu.dimension_semantics<arbitrary>], iteration_bounds = array<i64: 3, 1, 1>, scalar_prefetch = 0 : i64, scratch_operands = 1 : i64, tpu.core_type = #tpu.core_type<tc>, window_params = [{transform_indices = @transform_0, window_bounds = array<i64: 1, 16, 16>}, {transform_indices = @transform_1, window_bounds = array<i64: 1, 16, 8>}, {transform_indices = @transform_2, window_bounds = array<i64: 1, 8, 128>}, {transform_indices = @transform_3, window_bounds = array<i64: 1, 16, 128>}]} {
    %c0_i32 = arith.constant 0 : i32
    %0 = arith.cmpi eq, %arg2, %c0_i32 : i32
    %1 = arith.extui %0 : i1 to i32
    %c0_i32_0 = arith.constant 0 : i32
    %2 = arith.cmpi ne, %1, %c0_i32_0 : i32
    scf.if %2 {
      %cst_16 = arith.constant 0.000000e+00 : f32
      %19 = vector.broadcast %cst_16 : f32 to vector<16x128xf32>
      %c0_17 = arith.constant 0 : index
      %c0_18 = arith.constant 0 : index
      %20 = vector.load %arg7[%c0_17, %c0_18] : memref<16x128xf32, #tpu.memory_space<vmem>>, vector<16x128xf32>
      tpu.vector_store %arg7[%c0_17, %c0_18], %19 {strides = array<i32>} : memref<16x128xf32, #tpu.memory_space<vmem>>, vector<16x128xf32>,
    } else {
    }
    %c0 = arith.constant 0 : index
    %c0_1 = arith.constant 0 : index
    %c0_2 = arith.constant 0 : index
    %3 = vector.load %arg5[%c0, %c0_1, %c0_2] : memref<1x8x128xf32, #tpu.memory_space<vmem>>, vector<1x8x128xf32>
    %4 = vector.shape_cast %3 : vector<1x8x128xf32> to vector<8x128xf32>
    %5 = arith.truncf %4 : vector<8x128xf32> to vector<8x128xbf16>
    %c0_3 = arith.constant 0 : index
    %c0_4 = arith.constant 0 : index
    %c0_5 = arith.constant 0 : index
    %6 = vector.load %arg4[%c0_3, %c0_4, %c0_5] : memref<1x16x8xbf16, #tpu.memory_space<vmem>>, vector<1x16x8xbf16>
    %7 = vector.shape_cast %6 : vector<1x16x8xbf16> to vector<16x8xbf16>
    %cst = arith.constant dense<0.000000e+00> : vector<16x128xf32>
    %8 = tpu.matmul %7, %5, %cst {dimension_numbers = #tpu.dot_dimension_numbers<[1], [0], [0], [1], [0, 0, 1, 1], [], []>} : vector<16x8xbf16>, vector<8x128xbf16>, vector<16x128xf32> -> vector<16x128xf32>
    %c0_6 = arith.constant 0 : index
    %c0_7 = arith.constant 0 : index
    %9 = vector.load %arg7[%c0_6, %c0_7] : memref<16x128xf32, #tpu.memory_space<vmem>>, vector<16x128xf32>
    %c0_8 = arith.constant 0 : index
    %c0_9 = arith.constant 0 : index
    %c0_10 = arith.constant 0 : index
    %10 = vector.load %arg3[%c0_8, %c0_9, %c0_10] : memref<1x16x16xbf16, #tpu.memory_space<vmem>>, vector<1x16x16xbf16>
    %11 = vector.shape_cast %10 : vector<1x16x16xbf16> to vector<16x16xbf16>
    %12 = arith.truncf %8 : vector<16x128xf32> to vector<16x128xbf16>
    %cst_11 = arith.constant dense<0.000000e+00> : vector<16x128xf32>
    %13 = tpu.matmul %11, %12, %cst_11 {dimension_numbers = #tpu.dot_dimension_numbers<[1], [0], [0], [1], [0, 0, 1, 1], [], []>} : vector<16x16xbf16>, vector<16x128xbf16>, vector<16x128xf32> -> vector<16x128xf32>
    %14 = arith.addf %9, %13 : vector<16x128xf32>
    %c0_12 = arith.constant 0 : index
    %c0_13 = arith.constant 0 : index
    %15 = vector.load %arg7[%c0_12, %c0_13] : memref<16x128xf32, #tpu.memory_space<vmem>>, vector<16x128xf32>
    tpu.vector_store %arg7[%c0_12, %c0_13], %14 {strides = array<i32>} : memref<16x128xf32, #tpu.memory_space<vmem>>, vector<16x128xf32>,
    %c0_i32_14 = arith.constant 0 : i32
    %16 = arith.cmpi eq, %arg2, %c0_i32_14 : i32
    %17 = arith.extui %16 : i1 to i32
    %c0_i32_15 = arith.constant 0 : i32
    %18 = arith.cmpi ne, %17, %c0_i32_15 : i32
    scf.if %18 {
      %c0_16 = arith.constant 0 : index
      %c0_17 = arith.constant 0 : index
      %19 = vector.load %arg7[%c0_16, %c0_17] : memref<16x128xf32, #tpu.memory_space<vmem>>, vector<16x128xf32>
      %cst_18 = arith.constant 0.000000e+00 : f32
      %20 = vector.broadcast %cst_18 : f32 to vector<16x128xf32>
      %21 = arith.cmpf oge, %19, %20 : vector<16x128xf32>
      %cst_19 = arith.constant 0.229166672 : f32
      %22 = vector.broadcast %cst_19 : f32 to vector<16x128xf32>
      %23 = arith.mulf %19, %22 : vector<16x128xf32>
      %24 = arith.select %21, %19, %23 : vector<16x128xi1>, vector<16x128xf32>
      %c0_20 = arith.constant 0 : index
      %c0_21 = arith.constant 0 : index
      %c0_22 = arith.constant 0 : index
      %25 = vector.load %arg6[%c0_20, %c0_21, %c0_22] : memref<1x16x128xf32, #tpu.memory_space<vmem>>, vector<1x16x128xf32>
      %26 = vector.shape_cast %25 : vector<1x16x128xf32> to vector<16x128xf32>
      %27 = vector.shape_cast %24 : vector<16x128xf32> to vector<1x16x128xf32>
      tpu.vector_store %arg6[%c0_20, %c0_21, %c0_22], %27 {strides = array<i32>} : memref<1x16x128xf32, #tpu.memory_space<vmem>>, vector<1x16x128xf32>,
    } else {
    }
    return
  }
  func.func @transform_0(%arg0: i32, %arg1: i32, %arg2: i32) -> (i32, i32, i32) {
    %c0_i32 = arith.constant 0 : i32
    return %arg0, %arg1, %arg2 : i32, i32, i32
  }
  func.func @transform_1(%arg0: i32, %arg1: i32, %arg2: i32) -> (i32, i32, i32) {
    %c0_i32 = arith.constant 0 : i32
    %c0_i32_0 = arith.constant 0 : i32
    return %arg0, %arg2, %c0_i32 : i32, i32, i32
  }
  func.func @transform_2(%arg0: i32, %arg1: i32, %arg2: i32) -> (i32, i32, i32) {
    %c0_i32 = arith.constant 0 : i32
    %c0_i32_0 = arith.constant 0 : i32
    %c0_i32_1 = arith.constant 0 : i32
    return %arg0, %c0_i32, %c0_i32_0 : i32, i32, i32
  }
  func.func @transform_3(%arg0: i32, %arg1: i32, %arg2: i32) -> (i32, i32, i32) {
    %c0_i32 = arith.constant 0 : i32
    %c0_i32_0 = arith.constant 0 : i32
    return %arg0, %arg1, %c0_i32 : i32, i32, i32
  }
}

</mosaic_0001>

<bundles_post_ra>
// kernel: _grcu_forward_stacked.3
= control target key start
LH: loop header
LB: loop body
LE: loop exit
PB: predicated region body
PF: predicated region fallthrough
CT: control target
= control target key end

     0   :  { %s652_s12 = smov 0   ;;  %s654_s13 = smov 0   ;;  %s691_s0 = inlined_call_operand.vmem [shape: bf16[3,16,16], index: 0, kind: input, shape index: {}]   ;;  %s692_s1 = inlined_call_operand.vmem [shape: bf16[3,16,8], index: 1, kind: input, shape index: {}]   ;;  %s693_s2 = inlined_call_operand.vmem [shape: f32[3,8,128], index: 2, kind: input, shape index: {}]   ;;  %s694_s3 = inlined_call_operand.vmem [shape: f32[3,16,128], index: 3, kind: output, shape index: {}]  }
   0x1   :  { %s656_s14 = smov 0  }
   0x2 LB: > { %s32_s15 = sadd.s32 1, %s624_s13  ;;  %p545_p0 = scmp.ge.s32.totalorder %s628_s14, 1  ;;  %s628_s14 = sphi %s656_s14, %s13_s14   ;;  %s624_s13 = sphi %s654_s13, %s696_s13   ;;  %s620_s12 = sphi %s652_s12, %s695_s12  }
   0x3   : > { %p34_p1 = scmp.ge.s32.totalorder %s32_s15, 3  ;;  %p196_p2 = scmp.lt.s32.totalorder %s628_s14, 4 }
   0x5   : > { %s698_s15 = smov (%p34_p1, %s32_s15), 0  ;;  %p197_p3 = pnand %p545_p0, %p196_p2 }
   0x6   : > { %p245_p4 = scmp.lt.s32.totalorder (!%p197_p3), %s620_s12, 2 }
   0x7   : > { %200 = sbr.rel (%p197_p3) target bundleno = 426 (0x1aa), region = 32 }
   0xc   : > { %v630_v0 = vmov 0.0   ;;  %vm631_vm0 = vmmov 0   ;;  %s700_s12 = smov (!%p245_p4, %s620_s12), 2  ;;  %vm301_vm1 = vcmask 1043456   ;;  %vm297_vm2 = vcmask 64512  }
   0xd   : > { %566 = vmatprep.subr.bf16.mxu0 %v630_v0  ;;  %568 = vmatprep.mubr.msk.bf16.mxu0 %vm631_vm0, %v630_v0  ;;  %s559_s16 = sshll.u32 %s700_s12, 3  ;;  %vm356_vm3 = vcmask 130048   ;;  %s561_s26 = sshll.u32 %s700_s12, 4 }
   0xe   : > { %572 = vmatprep.subr.bf16.mxu1 %v630_v0  ;;  %574 = vmatprep.mubr.msk.bf16.mxu1 %vm631_vm0, %v630_v0  ;;  %s265_s19 = scalar_lea.vmem %s692_s1, %s559_s16  ;;  %s255_s22 = scalar_lea.vmem %s691_s0, %s559_s16 }
   0xf   : > { %s270_s25 = scalar_lea.vmem %s693_s2, %s559_s16  ;;  %v604_v4 = vld [vmem:[%s265_s19] sm:$0xff]   ;;  %s279_s29 = scalar_lea.vmem %s694_s3, %s561_s26 }
  0x10   : > { %v288_v1 = vld [vmem:[%s270_s25] sm:$0xff] }
  0x11   : > { %v289_v2 = vpack.c.bf16 %v288_v1, %v288_v1  ;;  %v605_v10 = vld [vmem:[%s255_s22] sm:$0xff]  }
  0x13   : > { %v303_v3 = vsel %vm301_vm1, %v289_v2, 0 }
  0x14   : > { %567 = vmatpush3.bf16.msra.mxu0 %v303_v3 }
  0x17   : > { %569 = vmatmul.mubr.msk.bf16.vlgmr.msra.gmra.mxu0 %vm297_vm2, %v604_v4 }
  0xd7   : > { %v339_v5 = vpop.f32.mrf.mxu0 }
  0xd9   : > { %v570_v6 = vpop.f32.mrf.mxu0 }
  0xdb   : > { %v342_v7 = vpop.f32.mrf.mxu0 }
  0xdc   : > { %v350_v8 = vpack.c.bf16 %v342_v7, %v339_v5 }
  0xdd   : > { %v571_v9 = vpop.f32.mrf.mxu0 }
  0xde   : > { %573 = vmatpush3.bf16.msra.mxu1 %v350_v8 }
  0xe1   : > { %575 = vmatmul.mubr.msk.bf16.vlgmr.msra.gmra.mxu1 %vm356_vm3, %v605_v10 }
 0x1a1   : > { %v394_v11 = vpop.f32.mrf.mxu1 }
 0x1a2   : > { %vm410_vm4 = vcmp.ge.f32.partialorder %v394_v11, 0.0  ;;  %v412_v12 = vmul.f32 0.22916667, %v394_v11 }
 0x1a3   : > { %v576_v13 = vpop.f32.mrf.mxu1 }
 0x1a4   : > { %v414_v14 = vsel %vm410_vm4, %v394_v11, %v412_v12 }
 0x1a5   : > { %416 = vst [vmem:[%s279_s29] sm:$0xff] %v414_v14  ;;  %v397_v15 = vpop.f32.mrf.mxu1 }
 0x1a6   : > { %vm411_vm5 = vcmp.ge.f32.partialorder %v397_v15, 0.0  ;;  %v413_v16 = vmul.f32 0.22916667, %v397_v15 }
 0x1a7   : > { %v577_v17 = vpop.f32.mrf.mxu1 }
 0x1a8   : > { %v415_v18 = vsel %vm411_vm5, %v397_v15, %v413_v16 }
 0x1a9   : > { %417 = vst [vmem:[%s279_s29 + $0x8] sm:$0xff] %v415_v18 }
 0x1aa PF: > { %s13_s14 = sadd.s32 1, %s628_s14   ;;  %s695_s12 = smov %s624_s13 }
 0x1ab   : > { %p10_p5 = scmp.ge.s32.totalorder %s13_s14, 5   ;;  %s696_s13 = smov %s698_s15 }
 0x1ad   :  { %12 = sbr.rel (!%p10_p5) target bundleno = 2 (0x2), region = 76 }

// kernel: _grcu_forward_stacked.2
= control target key start
LH: loop header
LB: loop body
LE: loop exit
PB: predicated region body
PF: predicated region fallthrough
CT: control target
= control target key end

     0   :  { %vm31_vm0 = vcmask 64512   ;;  %v875_v0 = vmov 0.0   ;;  %vm876_vm1 = vmmov 0   ;;  %s1016_s6 = inlined_call_operand.vmem [shape: f32[8,128], index: 6, kind: input, shape index: {}]   ;;  %s1017_s4 = inlined_call_operand.vmem [shape: f32[8,8], index: 4, kind: input, shape index: {}]   ;;  %s1018_s3 = inlined_call_operand.vmem [shape: f32[8,8], index: 3, kind: input, shape index: {}]   ;;  %s1019_s1 = inlined_call_operand.vmem [shape: f32[3,8,128], index: 1, kind: input, shape index: {}]   ;;  %s1020_s5 = inlined_call_operand.vmem [shape: f32[8,8], index: 5, kind: input, shape index: {}]   ;;  %s1021_s0 = inlined_call_operand.vmem [shape: f32[3,8,128], index: 0, kind: input, shape index: {}]   ;;  %s1022_s2 = inlined_call_operand.vmem [shape: f32[3,8,128], index: 2, kind: input, shape index: {}]   ;;  %s1023_s7 = inlined_call_operand.vmem [shape: f32[3,8,128], index: 7, kind: output, shape index: {}]  }
   0x1   :  { %803 = vmatprep.subr.mxu1 %v875_v0  ;;  %v29_v1 = vld [vmem:[%s1016_s6] sm:$0xff]  ;;  %805 = vmatprep.mubr.msk.f32.mxu1 %vm876_vm1, %v875_v0  ;;  %v765_v31 = vld [vmem:[%s1019_s1 + $0x8] sm:$0xff]  ;;  %v774_v57 = vld [vmem:[%s1019_s1 + $0x10] sm:$0xff] }
   0x2   :  { %v926_v2 = vld [vmem:[%s1017_s4] sm:$0xff]  ;;  %804 = vmatpush3.msra.mxu1 %v29_v1  ;;  %798 = vmatprep.subr.mxu0 %v875_v0  ;;  %v762_v42 = vld [vmem:[%s1021_s0 + $0x8] sm:$0xff] }
   0x3   :  { %806 = vmatmul.mubr.msk.f32.vlgmr.msra.gmra.mxu1 %vm31_vm0, %v926_v2  ;;  %799 = vmatpush3.msra.mxu0 %v29_v1  ;;  %v940_v3 = vld [vmem:[%s1018_s3] sm:$0xff]  ;;  %v768_v47 = vld [vmem:[%s1022_s2 + $0x8] sm:$0xff] }
   0x4   :  { %800 = vmatprep.mubr.msk.f32.mxu0 %vm876_vm1, %v875_v0  ;;  %808 = vmatprep.subr.mxu0 %v875_v0  ;;  %v112_v4 = vld [vmem:[%s1019_s1] sm:$0xff] }
   0x5   :  { %813 = vmatprep.subr.mxu1 %v875_v0  ;;  %815 = vmatprep.mubr.msk.f32.mxu1 %vm876_vm1, %v875_v0  ;;  %v952_v13 = vld [vmem:[%s1020_s5] sm:$0xff] }
   0x6   :  { %801 = vmatmul.mubr.msk.f32.vlgmr.msra.gmra.mxu0 %vm31_vm0, %v940_v3  ;;  %v30_v16 = vld [vmem:[%s1021_s0] sm:$0xff] }
   0x7   :  { %810 = vmatprep.mubr.msk.f32.mxu0 %vm876_vm1, %v875_v0  ;;  %v193_v21 = vld [vmem:[%s1022_s2] sm:$0xff] }
  0xc3   :  { %v182_v5 = vpop.f32.mrf.mxu1 }
  0xc4   :  { %v186_v6 = vadd.f32 %v182_v5, %v112_v4 }
  0xc5   :  { %v807_v7 = vpop.f32.mrf.mxu1 }
  0xc6   :  { %v760_v8 = vmul.f32 -1.442695, %v186_v6  ;;  %v101_v14 = vpop.f32.mrf.mxu0 }
  0xc7   :  { %v105_v17 = vadd.f32 %v101_v14, %v30_v16 }
  0xc8   :  { %845 = vpow2.f32 %v760_v8  ;;  %v802_v15 = vpop.f32.mrf.mxu0 }
  0xc9   :  { %v758_v18 = vmul.f32 -1.442695, %v105_v17 }
  0xd5   :  { %v846_v9 = vpop.eup %845 }
  0xd6   :  { %v190_v10 = vadd.f32 1.0, %v846_v9  ;;  %v777_v9 = vld [vmem:[%s1022_s2 + $0x10] sm:$0xff] }
  0xd8   :  { %847 = vrcp.f32 %v190_v10 }
  0xd9   :  { %849 = vpow2.f32 %v758_v18 }
  0xe5   :  { %v848_v11 = vpop.eup %847 }
  0xe6   :  { %v194_v12 = vmul.f32 %v848_v11, %v29_v1  ;;  %v850_v19 = vpop.eup %849 }
  0xe7   :  { %v109_v20 = vadd.f32 1.0, %v850_v19 }
  0xe8   :  { %809 = vmatpush3.msra.mxu0 %v194_v12 }
  0xe9   :  { %811 = vmatmul.mubr.msk.f32.vlgmr.msra.gmra.mxu0 %vm31_vm0, %v952_v13  ;;  %818 = vmatprep.subr.mxu0 %v875_v0  ;;  %851 = vrcp.f32 %v109_v20 }
  0xea   :  { %820 = vmatprep.mubr.msk.f32.mxu0 %vm876_vm1, %v875_v0 }
  0xf6   :  { %v852_v25 = vpop.eup %851 }
  0xf7   :  { %v270_v26 = vsub.f32 1.0, %v852_v25 }
  0xf9   :  { %v271_v27 = vmul.f32 %v270_v26, %v29_v1 }
 0x1a9   :  { %v264_v22 = vpop.f32.mrf.mxu0 }
 0x1aa   :  { %v268_v23 = vadd.f32 %v264_v22, %v193_v21 }
 0x1ab   :  { %v812_v24 = vpop.f32.mrf.mxu0 }
 0x1ac   :  { %853 = vtanh.f32 %v268_v23 }
 0x1b9   :  { %v854_v28 = vpop.eup %853 }
 0x1ba   :  { %v272_v29 = vmul.f32 %v854_v28, %v852_v25 }
 0x1bc   :  { %v273_v30 = vadd.f32 %v272_v29, %v271_v27 }
 0x1be   :  { %814 = vmatpush3.msra.mxu1 %v273_v30  ;;  %819 = vmatpush3.msra.mxu0 %v273_v30  ;;  %274 = vst [vmem:[%s1023_s7] sm:$0xff] %v273_v30 }
 0x1bf   :  { %816 = vmatmul.mubr.msk.f32.vlgmr.msra.gmra.mxu1 %vm31_vm0, %v940_v3  ;;  %821 = vmatmul.mubr.msk.f32.vlgmr.msra.gmra.mxu0 %vm31_vm0, %v926_v2 }
 0x1c0   :  { %823 = vmatprep.subr.mxu1 %v875_v0  ;;  %825 = vmatprep.mubr.msk.f32.mxu1 %vm876_vm1, %v875_v0 }
 0x1c1   :  { %828 = vmatprep.subr.mxu0 %v875_v0  ;;  %830 = vmatprep.mubr.msk.f32.mxu0 %vm876_vm1, %v875_v0 }
 0x27f   :  { %v343_v32 = vpop.f32.mrf.mxu1  ;;  %v422_v33 = vpop.f32.mrf.mxu0 }
 0x280   :  { %v426_v34 = vadd.f32 %v765_v31, %v422_v33  ;;  %v347_v43 = vadd.f32 %v762_v42, %v343_v32 }
 0x281   :  { %v822_v35 = vpop.f32.mrf.mxu0  ;;  %v817_v36 = vpop.f32.mrf.mxu1 }
 0x282   :  { %v767_v37 = vmul.f32 -1.442695, %v426_v34  ;;  %v764_v44 = vmul.f32 -1.442695, %v347_v43 }
 0x284   :  { %855 = vpow2.f32 %v767_v37 }
 0x291   :  { %v856_v38 = vpop.eup %855 }
 0x292   :  { %v430_v39 = vadd.f32 1.0, %v856_v38 }
 0x294   :  { %857 = vrcp.f32 %v430_v39 }
 0x295   :  { %859 = vpow2.f32 %v764_v44 }
 0x2a1   :  { %v858_v40 = vpop.eup %857 }
 0x2a2   :  { %v435_v41 = vmul.f32 %v858_v40, %v273_v30  ;;  %v860_v45 = vpop.eup %859 }
 0x2a3   :  { %v351_v46 = vadd.f32 1.0, %v860_v45 }
 0x2a4   :  { %824 = vmatpush3.msra.mxu1 %v435_v41 }
 0x2a5   :  { %826 = vmatmul.mubr.msk.f32.vlgmr.msra.gmra.mxu1 %vm31_vm0, %v952_v13  ;;  %833 = vmatprep.subr.mxu1 %v875_v0  ;;  %861 = vrcp.f32 %v351_v46 }
 0x2a6   :  { %835 = vmatprep.mubr.msk.f32.mxu1 %vm876_vm1, %v875_v0 }
 0x2b2   :  { %v862_v51 = vpop.eup %861 }
 0x2b3   :  { %v508_v52 = vsub.f32 1.0, %v862_v51 }
 0x2b5   :  { %v509_v54 = vmul.f32 %v508_v52, %v273_v30 }
 0x365   :  { %v502_v48 = vpop.f32.mrf.mxu1 }
 0x366   :  { %v506_v49 = vadd.f32 %v768_v47, %v502_v48 }
 0x367   :  { %v827_v50 = vpop.f32.mrf.mxu1 }
 0x368   :  { %863 = vtanh.f32 %v506_v49 }
 0x375   :  { %v864_v53 = vpop.eup %863 }
 0x376   :  { %v510_v55 = vmul.f32 %v864_v53, %v862_v51 }
 0x378   :  { %v511_v56 = vadd.f32 %v510_v55, %v509_v54 }
 0x37a   :  { %829 = vmatpush3.msra.mxu0 %v511_v56  ;;  %834 = vmatpush3.msra.mxu1 %v511_v56  ;;  %770 = vst [vmem:[%s1023_s7 + $0x8] sm:$0xff] %v511_v56 }
 0x37b   :  { %831 = vmatmul.mubr.msk.f32.vlgmr.msra.gmra.mxu0 %vm31_vm0, %v940_v3  ;;  %836 = vmatmul.mubr.msk.f32.vlgmr.msra.gmra.mxu1 %vm31_vm0, %v926_v2 }
 0x37c   :  { %838 = vmatprep.subr.mxu0 %v875_v0  ;;  %840 = vmatprep.mubr.msk.f32.mxu0 %vm876_vm1, %v875_v0  ;;  %v771_v0 = vld [vmem:[%s1021_s0 + $0x10] sm:$0xff] }
 0x43b   :  { %v582_v58 = vpop.f32.mrf.mxu0  ;;  %v661_v59 = vpop.f32.mrf.mxu1 }
 0x43c   :  { %v665_v60 = vadd.f32 %v774_v57, %v661_v59  ;;  %v586_v5 = vadd.f32 %v771_v0, %v582_v58 }
 0x43d   :  { %v837_v61 = vpop.f32.mrf.mxu1  ;;  %v832_v62 = vpop.f32.mrf.mxu0 }
 0x43e   :  { %v776_v63 = vmul.f32 -1.442695, %v665_v60  ;;  %v773_v6 = vmul.f32 -1.442695, %v586_v5 }
 0x440   :  { %865 = vpow2.f32 %v776_v63 }
 0x44d   :  { %v866_v1 = vpop.eup %865 }
 0x44e   :  { %v669_v3 = vadd.f32 1.0, %v866_v1 }
 0x450   :  { %867 = vrcp.f32 %v669_v3 }
 0x451   :  { %869 = vpow2.f32 %v773_v6 }
 0x45d   :  { %v868_v2 = vpop.eup %867 }
 0x45e   :  { %v674_v4 = vmul.f32 %v868_v2, %v511_v56  ;;  %v870_v7 = vpop.eup %869 }
 0x45f   :  { %v590_v8 = vadd.f32 1.0, %v870_v7 }
 0x460   :  { %839 = vmatpush3.msra.mxu0 %v674_v4 }
 0x461   :  { %841 = vmatmul.mubr.msk.f32.vlgmr.msra.gmra.mxu0 %vm31_vm0, %v952_v13  ;;  %871 = vrcp.f32 %v590_v8 }
 0x46e   :  { %v872_v14 = vpop.eup %871 }
 0x46f   :  { %v747_v13 = vsub.f32 1.0, %v872_v14 }
 0x471   :  { %v748_v16 = vmul.f32 %v747_v13, %v511_v56 }
 0x521   :  { %v741_v10 = vpop.f32.mrf.mxu0 }
 0x522   :  { %v745_v11 = vadd.f32 %v777_v9, %v741_v10 }
 0x523   :  { %v842_v12 = vpop.f32.mrf.mxu0 }
 0x524   :  { %873 = vtanh.f32 %v745_v11 }
 0x531   :  { %v874_v15 = vpop.eup %873 }
 0x532   :  { %v749_v17 = vmul.f32 %v874_v15, %v872_v14 }
 0x534   :  { %v750_v18 = vadd.f32 %v749_v17, %v748_v16 }
 0x536   :  { %779 = vst [vmem:[%s1023_s7 + $0x10] sm:$0xff] %v750_v18 }

</bundles_post_ra>
